<compile_context>
chip_gen: v7x
topology: tpu7x:2x2x1
jax: 0.10.0
libtpu: 0.0.40
codegen_flags: <defaults>
</compile_context>

<pallas_src>
import functools

import jax
import jax.numpy as jnp
from jax import lax
from jax.experimental import pallas as pl
from jax.experimental.pallas import tpu as pltpu


_LANE = 128                           # feature axis padded to a multiple of this
_TARGET_BLOCK_BYTES = 8 * 1024 * 1024  # aim for ~8 MiB input blocks per grid step


def _round_up(x, m):
    return (x + m - 1) // m * m


def _vmem_budget_and_limit():
    """Generation-gated (VMEM capacity) live-buffer budget and Mosaic limit."""
    cap = None
    try:
        cap = getattr(pltpu.get_tpu_info(), "vmem_capacity_bytes", None)
    except Exception:
        cap = None
    if cap is None:
        cap = 64 * 1024 * 1024  # conservative: assume v7x-sized VMEM
    if cap >= 128 * 1024 * 1024:      # v5e / v6e
        return 88 * 1024 * 1024, 100 * 1024 * 1024
    return 40 * 1024 * 1024, 48 * 1024 * 1024   # v7x (64 MiB per TC)


def _choose_tile_rows(n_rows, feats_padded, dtype_size, vmem_budget, stable):
    """Byte-targeted row tile that fits the live-VMEM budget."""
    # Sub-32-bit dtypes pack along sublanes: keep rows aligned to the packing.
    row_align = 8 if dtype_size >= 4 else (16 if dtype_size == 2 else 32)
    # Live set per tile row: 2 double-buffered input copies + 2 output copies
    # in the I/O dtype, plus two fp32 block temporaries (xf, xc); one more
    # fp32 temp when the stable path builds an iota/where mask.
    n_f32_temps = 2 + (1 if stable else 0)
    per_row = feats_padded * (4 * dtype_size + 4 * n_f32_temps)
    budget_rows = max(row_align, vmem_budget // per_row)
    target_rows = max(row_align, _TARGET_BLOCK_BYTES // (feats_padded * dtype_size))
    tile = min(budget_rows, target_rows)
    tile = max(row_align, (tile // row_align) * row_align)
    # Don't make the tile bigger than the (row-aligned) problem itself.
    tile = min(tile, _round_up(n_rows, row_align))
    # Megacore: make sure the "parallel" row axis has >= 2 tiles when possible
    # so v7x's two TensorCores both get work.
    if tile >= n_rows and n_rows > row_align:
        tile = min(tile, _round_up((n_rows + 1) // 2, row_align))
    return max(tile, row_align)


def _layernorm_kernel(x_ref, g_ref, o_ref, *, eps, stable, feats, feats_padded):
    """Row-wise LayerNorm on a (tile_rows, feats_padded) VMEM block.

    Padded feature columns (index >= feats) contain zeros in x and g; they
    contribute nothing to the mean sum, and the variance gets an exact scalar
    correction for the n_pad columns (where (0 - mean)^2 == mean^2). Ragged
    row blocks contain garbage rows whose results Pallas never writes back.
    """
    xf = x_ref[...].astype(jnp.float32)
    n_pad = feats_padded - feats
    inv_n = jnp.float32(1.0 / feats)

    if stable:
        # x = x / x.amax(dim=-1, keepdim=True)  (detach is a no-op in forward)
        if n_pad:
            col = lax.broadcasted_iota(jnp.int32, xf.shape, xf.ndim - 1)
            xmax_src = jnp.where(col < feats, xf, -jnp.inf)
        else:
            xmax_src = xf
        row_max = jnp.max(xmax_src, axis=-1, keepdims=True)
        xf = xf * pl.reciprocal(row_max, approx=False)   # EUP, keeps zeros zero

    # Mean over the true feature count (padded cols are zero -> no mask).
    mean = jnp.sum(xf, axis=-1, keepdims=True) * inv_n
    xc = xf - mean
    var = jnp.sum(xc * xc, axis=-1, keepdims=True)
    if n_pad:
        # Exact correction: padded cols contribute (0 - mean)^2 each.
        var = var - jnp.float32(n_pad) * (mean * mean)
    var = jnp.maximum(var * inv_n, 0.0)
    inv = lax.rsqrt(var + eps)

    # Match the PyTorch order: normalize in fp32, downcast, then scale by g
    # in the I/O dtype.
    o_ref[...] = (xc * inv).astype(o_ref.dtype) * g_ref[...]


def layernorm_pallas(x, g, *, stable=False):
    """LayerNorm over the last axis of x with scale g (shape (feats,))."""
    orig_shape = x.shape
    feats = orig_shape[-1]
    assert g.shape == (feats,), f"g must have shape ({feats},), got {g.shape}"

    dtype = x.dtype
    dtype_size = jnp.dtype(dtype).itemsize
    # eps matches the PyTorch module's dtype-dependent choice.
    eps = 1e-5 if dtype == jnp.float32 else 1e-3

    n_rows = 1
    for d in orig_shape[:-1]:
        n_rows *= d

    feats_padded = _round_up(feats, _LANE)
    vmem_budget, vmem_limit = _vmem_budget_and_limit()
    tile_rows = _choose_tile_rows(n_rows, feats_padded, dtype_size,
                                  vmem_budget, stable)
    grid = (pl.cdiv(n_rows, tile_rows),)

    # Only the feature axis ever gets an HBM-side pad (and only if needed);
    # the ragged row axis is handled by Pallas' partial last block.
    x2 = x.reshape(n_rows, feats)
    g2 = g.astype(dtype).reshape(1, feats)   # matches self.g.type(dtype)
    if feats_padded != feats:
        x2 = jnp.pad(x2, ((0, 0), (0, feats_padded - feats)))
        g2 = jnp.pad(g2, ((0, 0), (0, feats_padded - feats)))

    kernel = functools.partial(
        _layernorm_kernel, eps=eps, stable=stable,
        feats=feats, feats_padded=feats_padded)

    cost = pl.CostEstimate(
        flops=7 * n_rows * feats,
        transcendentals=n_rows,
        bytes_accessed=2 * n_rows * feats * dtype_size + feats * dtype_size,
    )

    out = pl.pallas_call(
        kernel,
        out_shape=jax.ShapeDtypeStruct((n_rows, feats_padded), dtype),
        grid_spec=pltpu.PrefetchScalarGridSpec(
            num_scalar_prefetch=0,
            grid=grid,
            in_specs=[
                pl.BlockSpec((tile_rows, feats_padded), lambda i: (i, 0)),
                pl.BlockSpec((1, feats_padded), lambda i: (0, 0)),
            ],
            out_specs=pl.BlockSpec((tile_rows, feats_padded), lambda i: (i, 0)),
        ),
        compiler_params=pltpu.CompilerParams(
            dimension_semantics=("parallel",),   # row axis shards across TCs
            vmem_limit_bytes=vmem_limit,
        ),
        cost_estimate=cost,
    )(x2, g2)

    if feats_padded != feats:
        out = out[:, :feats]
    return out.reshape(orig_shape)


def layernorm_ref(x, g, *, stable=False):
    """Pure-JAX reference matching the PyTorch forward (scale-only, no bias)."""
    dtype = x.dtype
    xf = x.astype(jnp.float32)
    if stable:
        xf = xf / jnp.max(xf, axis=-1, keepdims=True)
    eps = 1e-5 if dtype == jnp.float32 else 1e-3
    mean = jnp.mean(xf, axis=-1, keepdims=True)
    var = jnp.mean((xf - mean) ** 2, axis=-1, keepdims=True)
    return ((xf - mean) * lax.rsqrt(var + eps)).astype(dtype) * g.astype(dtype)


if __name__ == "__main__":
    key = jax.random.PRNGKey(0)
    batch, seq, hidden = 2, 8, 32

    kx, _ = jax.random.split(key)
    x = jax.random.normal(kx, (batch, seq, hidden), dtype=jnp.float32)
    # Deterministic parameter init matching torch.nn.Parameter(torch.ones(feats)).
    g = jnp.ones((hidden,), dtype=jnp.float32)

    y = layernorm_pallas(x, g, stable=False)
    jax.block_until_ready(y)

    y_ref = layernorm_ref(x, g, stable=False)
    assert y.shape == x.shape and y.dtype == x.dtype
    assert jnp.allclose(y, y_ref, atol=1e-5, rtol=1e-5), "mismatch vs reference"

    print("KERNEL_OK")
</pallas_src>

<mosaic_0001>
module attributes {stable_mosaic.version = 11 : i64} {
  func.func @_layernorm_kernel(%arg0: i32, %arg1: memref<8x128xf32, #tpu.memory_space<vmem>>, %arg2: memref<1x128xf32, #tpu.memory_space<vmem>>, %arg3: memref<8x128xf32, #tpu.memory_space<vmem>>) attributes {dimension_semantics = [#tpu.dimension_semantics<parallel>], iteration_bounds = array<i64: 2>, scalar_prefetch = 0 : i64, scratch_operands = 0 : i64, tpu.core_type = #tpu.core_type<tc>, window_params = [{transform_indices = @transform_0, window_bounds = array<i64: 8, 128>}, {pipeline_mode = #tpu.pipeline_mode<synchronous>, transform_indices = @transform_1, window_bounds = array<i64: 1, 128>}, {transform_indices = @transform_2, window_bounds = array<i64: 8, 128>}]} {
    %c0 = arith.constant 0 : index
    %c0_0 = arith.constant 0 : index
    %0 = vector.load %arg1[%c0, %c0_0] : memref<8x128xf32, #tpu.memory_space<vmem>>, vector<8x128xf32>
    %cst = arith.constant dense<0.000000e+00> : vector<8xf32>
    %1 = vector.multi_reduction <add>, %0, %cst [1] : vector<8x128xf32> to vector<8xf32>
    %2 = vector.shape_cast %1 : vector<8xf32> to vector<8x1xf32>
    %cst_1 = arith.constant 3.125000e-02 : f32
    %3 = vector.broadcast %cst_1 : f32 to vector<8x1xf32>
    %4 = arith.mulf %2, %3 : vector<8x1xf32>
    %5 = vector.broadcast %4 : vector<8x1xf32> to vector<8x128xf32>
    %6 = arith.subf %0, %5 : vector<8x128xf32>
    %7 = arith.mulf %6, %6 : vector<8x128xf32>
    %cst_2 = arith.constant dense<0.000000e+00> : vector<8xf32>
    %8 = vector.multi_reduction <add>, %7, %cst_2 [1] : vector<8x128xf32> to vector<8xf32>
    %9 = vector.shape_cast %8 : vector<8xf32> to vector<8x1xf32>
    %10 = arith.mulf %4, %4 : vector<8x1xf32>
    %cst_3 = arith.constant 9.600000e+01 : f32
    %11 = vector.broadcast %cst_3 : f32 to vector<8x1xf32>
    %12 = arith.mulf %11, %10 : vector<8x1xf32>
    %13 = arith.subf %9, %12 : vector<8x1xf32>
    %cst_4 = arith.constant 3.125000e-02 : f32
    %14 = vector.broadcast %cst_4 : f32 to vector<8x1xf32>
    %15 = arith.mulf %13, %14 : vector<8x1xf32>
    %cst_5 = arith.constant 0.000000e+00 : f32
    %16 = vector.broadcast %cst_5 : f32 to vector<8x1xf32>
    %17 = arith.maximumf %15, %16 : vector<8x1xf32>
    %cst_6 = arith.constant 9.99999974E-6 : f32
    %18 = vector.broadcast %cst_6 : f32 to vector<8x1xf32>
    %19 = arith.addf %17, %18 : vector<8x1xf32>
    %20 = math.rsqrt %19 : vector<8x1xf32>
    %21 = vector.broadcast %20 : vector<8x1xf32> to vector<8x128xf32>
    %22 = arith.mulf %6, %21 : vector<8x128xf32>
    %c0_7 = arith.constant 0 : index
    %c0_8 = arith.constant 0 : index
    %23 = vector.load %arg2[%c0_7, %c0_8] : memref<1x128xf32, #tpu.memory_space<vmem>>, vector<1x128xf32>
    %24 = vector.broadcast %23 : vector<1x128xf32> to vector<8x128xf32>
    %25 = arith.mulf %22, %24 : vector<8x128xf32>
    %c0_9 = arith.constant 0 : index
    %c0_10 = arith.constant 0 : index
    %26 = vector.load %arg3[%c0_9, %c0_10] : memref<8x128xf32, #tpu.memory_space<vmem>>, vector<8x128xf32>
    tpu.vector_store %arg3[%c0_9, %c0_10], %25 {strides = array<i32>} : memref<8x128xf32, #tpu.memory_space<vmem>>, vector<8x128xf32>,
    return
  }
  func.func @transform_0(%arg0: i32) -> (i32, i32) {
    %c0_i32 = arith.constant 0 : i32
    %c0_i32_0 = arith.constant 0 : i32
    return %arg0, %c0_i32 : i32, i32
  }
  func.func @transform_1(%arg0: i32) -> (i32, i32) {
    %c0_i32 = arith.constant 0 : i32
    %c0_i32_0 = arith.constant 0 : i32
    %c0_i32_1 = arith.constant 0 : i32
    return %c0_i32, %c0_i32_0 : i32, i32
  }
  func.func @transform_2(%arg0: i32) -> (i32, i32) {
    %c0_i32 = arith.constant 0 : i32
    %c0_i32_0 = arith.constant 0 : i32
    return %arg0, %c0_i32 : i32, i32
  }
}

</mosaic_0001>

<bundles_post_ra>
// kernel: tpu_custom_call.1
= control target key start
LH: loop header
LB: loop body
LE: loop exit
PB: predicated region body
PF: predicated region fallthrough
CT: control target
= control target key end

     0   :  { %7 = vsyncpa [#allocation3], 0  ;;  %s608_s0 = inlined_call_operand.hbm [shape: f32[16,128], index: 0, kind: input, shape index: {}]   ;;  %s609_s1 = inlined_call_operand.vmem [shape: f32[1,128], index: 1, kind: input, shape index: {}]   ;;  %s610_s2 = inlined_call_operand.hbm [shape: f32[16,128], index: 2, kind: output, shape index: {}]  }
   0x1   :  { %9 = vsyncpa [#allocation3 + $0x1], 0 }
   0x2   :  { %10 = vsyncpa [#allocation4], 0 }
   0x3   :  { %12 = vsyncpa [#allocation4 + $0x1], 0  ;;  %s444_s9 = smov 0   ;;  %s446_s10 = smov 0  }
   0x4   :  { %s448_s11 = smov 0   ;;  %s450_s12 = smov 0  }
   0x5 LB: > { %s465_s13 = sadd.s32 4294967295, %s425_s12   ;;  %s268_s14 = sadd.s32 4294967294, %s425_s12   ;;  %s425_s12 = sphi %s450_s12, %s625_s12   ;;  %s421_s11 = sphi %s448_s11, %s624_s11   ;;  %s417_s10 = sphi %s446_s10, %s623_s10   ;;  %s413_s9 = sphi %s444_s9, %s622_s9  }
   0x6   : > { %s469_s15 = sadd.s32 1, %s425_s12   ;;  %s25_s16 = sadd.s32 1, %s421_s11 }
   0x7   : > { %s22_s17 = ssub.s32 %s425_s12, %s469_s15  ;;  %p32_p0 = scmp.ne.s32.totalorder %s421_s11, %s417_s10 }
   0x8   : > { %p23_p1 = scmp.eq.s32.totalorder %s22_s17, 0  ;;  %p33_p2 = scmp.eq.s32.totalorder %s425_s12, 0 }
   0x9   : > { %p38_p3 = scmp.ne.s32.totalorder %s417_s10, %s413_s9  ;;  %p39_p4 = scmp.eq.s32.totalorder %s465_s13, 0 }
   0xa   : > { %s481_s18 = scalar_select %p23_p1, %s421_s11, %s25_s16  }
   0xb   : > { %p483_p5 = por %p33_p2, %p32_p0  ;;  %p487_p6 = por %p39_p4, %p38_p3 }
   0xc   : > { %p83_p7 = scmp.eq.s32.totalorder %s465_s13, 1  ;;  %p89_p8 = scmp.eq.s32.totalorder %s268_s14, 1 }
   0xd   : > { %p293_p10 = scmp.lt.s32.totalorder %s425_s12, 2  ;;  %s112_s23 = sand.u32 1, %s421_s11  }
   0xe   : > { %p494_p11 = por %p83_p7, %p32_p0  ;;  %p498_p12 = por %p89_p8, %p38_p3 }
   0xf   : > { %s272_s24 = sshll.u32 %s425_s12, 7  ;;  %s271_s25 = sshll.u32 %s112_s23, 3 }
  0x10   : > { %s614_s21 = scalar_select %p494_p11, 1, 0 }
  0x11   : > { %s615_s22 = scalar_select %p498_p12, 1, 0 }
  0x12   : > { %s507_s28 = scalar_lea.hbm %s608_s0, %s272_s24  ;;  %s116_s29 = scalar_lea.vmem [#allocation2], %s271_s25 }
  0x13   : > { %s123_s30 = sshll.u32 %s116_s29, 4  ;;  %p511_p13 = pnand %p293_p10, %p483_p5  ;;  %s515_s30 = int_to_ptr.vmem [resolvable:$true] %s123_s30 }
  0x14   : > { %s113_s4 = scalar_lea.sflag [#allocation3], %s112_s23  ;;  %s329_s5 = scalar_lea.hbm %s507_s28, 128 }
  0x15   : > { %p330_p2 = scmp.ne.s32.totalorder %s507_s28, %s329_s5  ;;  %p331_p3 = pneg %p511_p13 }
  0x16   : > { %s334_s8 = scalar_lea.hbm %s608_s0, 256  ;;  %p335_p5 = scmp.lt.u32.totalorder %s507_s28, %s608_s0 }
  0x17   : > { %p332_p4 = pnand %p331_p3, %p330_p2  ;;  %p336_p8 = scmp.lt.u32.totalorder %s334_s8, %s329_s5 }
  0x18   : > { %p338_p9 = scmp.lt.u32.totalorder %s329_s5, %s507_s28 }
  0x19   : > { %p333_p7 = pneg %p332_p4  ;;  %p337_p10 = por %p336_p8, %p335_p5 }
  0x1b   : > { %p339_p0 = por %p338_p9, %p337_p10 }
  0x1d   : > { %p340_p1 = pnand %p339_p0, %p333_p7 }
  0x1f   : > { %343 = shalt.err (!%p340_p1)
}
  0x20   : > { %s344_s17 = scalar_lea.vmem %s515_s30, 128  ;;  %s427_s19 = smov [#allocation2]  }
  0x21   : > { %p345_p2 = scmp.ne.s32.totalorder %s515_s30, %s344_s17  ;;  %s349_s23 = sshll.u32 %s427_s19, 4  ;;  %s350_s23 = int_to_ptr.vmem [resolvable:$false] %s349_s23 }
  0x22   : > { %s351_s24 = scalar_lea.vmem %s350_s23, 256  ;;  %p352_p11 = scmp.lt.s32.totalorder %s515_s30, %s350_s23 }
  0x23   : > { %p347_p4 = pnand %p345_p2, %p331_p3  ;;  %p353_p5 = scmp.lt.s32.totalorder %s351_s24, %s344_s17 }
  0x25   : > { %p348_p12 = pneg %p347_p4  ;;  %p354_p8 = por %p353_p5, %p352_p11 }
  0x27   : > { %p355_p9 = pnand %p354_p8, %p348_p12 }
  0x29   : > { %358 = shalt.err (!%p355_p9)
}
  0x2a   : > { %288 = dma.hbm_to_vmem [thread:$0]  (!%p511_p13), %s507_s28, 128, %s515_s30, %s113_s4  }
  0x2b   : > { %p617_p0 = scmp.lt.s32.totalorder %s425_s12, 3  ;;  %p618_p1 = scmp.ge.s32.totalorder %s425_s12, 1 }
  0x2d   : > { %p129_p3 = pnand %p618_p1, %p617_p0 }
  0x2e   : > { %s549_s25 = sand.u32 (!%p129_p3), 1, %s417_s10  }
  0x2f   : > { %132 = sbr.rel (%p129_p3) target bundleno = 383 (0x17f), region = 28  ;;  %s274_s26 = sshll.u32 (!%p129_p3), %s549_s25, 3 }
  0x30   : > { %s135_s27 = scalar_lea.sflag (!%p129_p3), [#allocation3], %s549_s25  ;;  %s138_s29 = scalar_lea.vmem (!%p129_p3), [#allocation2], %s274_s26 }
  0x36   : > { %404 = dma.done.wait (%p487_p6), %s135_s27, 128  }
  0x37   : > { %406 = vsyncadd (%p487_p6), %s135_s27, 4294967168  ;;  %v159_v0 = vld [vmem:[%s138_s29] sm:$0xff]  ;;  %s278_s30 = sshll.u32 %s465_s13, 7  ;;  %s158_s3 = scalar_lea.vmem [#allocation5], %s274_s26 }
  0x38   : > { %160 = vadd.xlane.f32.xlu0 %v159_v0  ;;  %v276_v13 = vld [vmem:[%s609_s1] ss:$0 sm:$0xff]  ;;  %s198_s4 = sshll.u32 %s158_s3, 4  ;;  %s564_s7 = scalar_lea.hbm %s610_s2, %s278_s30  ;;  %s566_s4 = int_to_ptr.vmem [resolvable:$true] %s198_s4 }
  0x39   : > { %s185_s8 = scalar_lea.sflag [#allocation4], %s549_s25  ;;  %s359_s14 = scalar_lea.vmem %s566_s4, 128 }
  0x3a   : > { %p360_p6 = scmp.ne.s32.totalorder %s566_s4, %s359_s14  ;;  %p619_p11 = scmp.ne.s32.totalorder %s614_s21, 0 }
  0x3b   : > { %s428_s13 = smov [#allocation5]  }
  0x3c   : > { %p361_p12 = pnand %p360_p6, %p619_p11  ;;  %s363_s16 = sshll.u32 %s428_s13, 4  ;;  %s364_s16 = int_to_ptr.vmem [resolvable:$false] %s363_s16 }
  0x3d   : > { %s365_s17 = scalar_lea.vmem %s364_s16, 256  ;;  %p366_p7 = scmp.lt.s32.totalorder %s566_s4, %s364_s16 }
  0x3e   : > { %p362_p13 = pneg %p361_p12  ;;  %p367_p10 = scmp.lt.s32.totalorder %s365_s17, %s359_s14 }
  0x40   : > { %p368_p2 = por %p367_p10, %p366_p7 }
  0x42   : > { %p369_p4 = pnand %p368_p2, %p362_p13 }
  0xc5   : > { %v161_v1 = vpop.xlane.xlu0 %160 }
  0xc6   : > { %v162_v2 = vmul.f32 0.03125, %v161_v1 }
  0xc8   : > { %v163_v3 = vsub.f32 %v159_v0, %v162_v2  ;;  %v167_v5 = vmul.f32 %v162_v2, %v162_v2 }
  0xca   : > { %v164_v4 = vmul.f32 %v163_v3, %v163_v3  ;;  %v168_v6 = vmul.f32 96.0, %v167_v5 }
  0xcc   : > { %165 = vadd.xlane.f32.xlu0 %v164_v4 }
 0x159   : > { %v166_v7 = vpop.xlane.xlu0 %165 }
 0x15a   : > { %v169_v8 = vsub.f32 %v166_v7, %v168_v6 }
 0x15c   : > { %v170_v9 = vmul.f32 0.03125, %v169_v8 }
 0x15e   : > { %v171_v10 = vmax.f32 %v170_v9, 0.0 }
 0x160   : > { %v172_v11 = vadd.f32 1e-05, %v171_v10 }
 0x162   : > { %327 = vrsqrt.f32 %v172_v11 }
 0x16c   : > { %v328_v12 = vpop.eup %327 }
 0x16d   : > { %v174_v14 = vmul.f32 %v328_v12, %v163_v3 }
 0x16f   : > { %v182_v15 = vmul.f32 %v276_v13, %v174_v14 }
 0x171   : > { %183 = vst [vmem:[%s158_s3] sm:$0xff] %v182_v15 }
 0x172   : > { %372 = shalt.err (!%p369_p4)
}
 0x173   : > { %s373_s19 = scalar_lea.hbm %s564_s7, 128  ;;  %s377_s25 = scalar_lea.hbm %s610_s2, 256 }
 0x174   : > { %p374_p5 = scmp.ne.s32.totalorder %s564_s7, %s373_s19  ;;  %p378_p0 = scmp.lt.u32.totalorder %s564_s7, %s610_s2 }
 0x175   : > { %p379_p1 = scmp.lt.u32.totalorder %s377_s25, %s373_s19  ;;  %p381_p6 = scmp.lt.u32.totalorder %s373_s19, %s564_s7 }
 0x176   : > { %p375_p8 = pnand %p374_p5, %p619_p11 }
 0x177   : > { %p380_p3 = por %p379_p1, %p378_p0 }
 0x178   : > { %p376_p9 = pneg %p375_p8 }
 0x179   : > { %p382_p12 = por %p381_p6, %p380_p3 }
 0x17b   : > { %p383_p13 = pnand %p382_p12, %p376_p9 }
 0x17d   : > { %386 = shalt.err (!%p383_p13)
}
 0x17e   : > { %283 = dma.vmem_to_hbm [thread:$0]  (%p619_p11), %s566_s4, 128, %s564_s7, %s185_s8  }
 0x17f PF: > { %s210_s29 = sand.u32 1, %s413_s9   ;;  %p620_p7 = scmp.ne.s32.totalorder %s615_s22, 0 }
 0x180   : > { %p621_p10 = scmp.ge.s32.totalorder %s425_s12, 2  ;;  %s211_s20 = scalar_lea.sflag [#allocation4], %s210_s29 }
 0x182   : > { %p290_p2 = pnand %p621_p10, %p620_p7 }
 0x184   : > { %408 = dma.done.wait (!%p290_p2), %s211_s20, 128  }
 0x185   : > { %410 = vsyncadd (!%p290_p2), %s211_s20, 4294967168  ;;  %p15_p4 = scmp.ge.s32.totalorder %s469_s15, 4   ;;  %s622_s9 = smov %s417_s10 }
 0x186   : > { %s623_s10 = smov %s421_s11  ;;  %s624_s11 = smov %s481_s18 }
 0x187   : > { %s625_s12 = smov %s469_s15  ;;  %17 = sbr.rel (!%p15_p4) target bundleno = 5 (0x5), region = 73 }
 0x18e   :  { %216 = vsyncpa [#allocation3], 1 }
 0x18f   :  { %218 = vsyncpa [#allocation3 + $0x1], 1 }
 0x190   :  { %219 = vsyncpa [#allocation4], 1 }
 0x191   :  { %221 = vsyncpa [#allocation4 + $0x1], 1 }

</bundles_post_ra>
